<compile_context>
chip_gen: v6e
topology: v6e:2x2x1
jax: 0.10.0
libtpu: 0.0.40
codegen_flags: <defaults>
</compile_context>

<pallas_src>
import jax
import jax.numpy as jnp
from jax.experimental import pallas as pl
from jax.experimental.pallas import tpu as pltpu

DEFAULT_EPS = 1e-5


def _vmem_capacity_bytes() -> int:
    """Physical VMEM of the current TPU generation; conservative fallback."""
    try:
        info = pltpu.get_tpu_info()
        cap = getattr(info, "vmem_capacity_bytes", None)
        if cap:
            return int(cap)
    except Exception:
        pass
    return 64 * 1024 * 1024  # v7x-sized fallback: safe on every generation


def _choose_tile_rows(rows: int, dim: int, itemsize: int) -> int:
    """Pick a row-tile so one block's working set uses a small slice of VMEM.

    Working set per grid step ~= 2x double-buffered input + 2x double-buffered
    output (in x dtype) + two f32 temporaries (x_f32 and x*x). Budgeting the
    f32 copy at ~1/8 of VMEM keeps the total comfortably under 60% of physical
    VMEM on v5e/v6e (128 MiB) and v7x (64 MiB) while giving big enough tiles
    to amortize per-step overhead.
    """
    capacity = _vmem_capacity_bytes()
    budget = capacity // 8
    per_row_bytes = dim * (4 + itemsize)          # f32 working copy + io block
    max_rows = budget // max(per_row_bytes, 1)
    max_rows = max(8, (max_rows // 8) * 8)        # sublane multiple
    tile = min(max_rows, 2048)                    # diminishing returns past this
    rows_rounded = ((rows + 7) // 8) * 8
    tile = min(tile, rows_rounded)                # don't exceed what's needed
    return max(tile, 8)


def _rmsnorm_kernel(x_ref, w_ref, o_ref, *, eps: float, inv_dim: float):
    # x_ref: (tile_rows, hidden) block, w_ref: (1, hidden) weight (resident).
    x = x_ref[...].astype(jnp.float32)                        # x.float()
    ms = jnp.sum(x * x, axis=-1, keepdims=True) * inv_dim     # pow(2).mean(-1)
    inv = jax.lax.rsqrt(ms + eps)                             # 1/sqrt on EUP
    y = (x * inv).astype(o_ref.dtype)                         # .type_as(x)
    o_ref[...] = y * w_ref[...].astype(o_ref.dtype)           # output * weight


def rmsnorm(x: jax.Array, weight: jax.Array, *, eps: float = DEFAULT_EPS,
            tile_rows: int | None = None) -> jax.Array:
    """x: (..., dim) float array, weight: (dim,) float array."""
    orig_shape = x.shape
    dim = orig_shape[-1]
    rows = 1
    for s in orig_shape[:-1]:
        rows *= s

    x2d = x.reshape(rows, dim)
    w2d = weight.reshape(1, dim)

    if tile_rows is None:
        tile_rows = _choose_tile_rows(rows, dim, x.dtype.itemsize)

    grid = (pl.cdiv(rows, tile_rows),)

    # Explicit VMEM limit: double-buffered in/out blocks + f32 temporaries
    # + weight + headroom, capped below the physical VMEM of this chip.
    capacity = _vmem_capacity_bytes()
    block_io = tile_rows * dim * x.dtype.itemsize
    block_f32 = tile_rows * dim * 4
    needed = 2 * 2 * block_io + 2 * block_f32 + dim * 4 + (4 << 20)
    vmem_limit = min(int(capacity * 0.8), max(32 << 20, needed))

    kernel = lambda x_ref, w_ref, o_ref: _rmsnorm_kernel(
        x_ref, w_ref, o_ref, eps=eps, inv_dim=1.0 / dim)

    out2d = pl.pallas_call(
        kernel,
        out_shape=jax.ShapeDtypeStruct((rows, dim), x.dtype),
        grid_spec=pltpu.PrefetchScalarGridSpec(
            num_scalar_prefetch=0,
            grid=grid,
            in_specs=[
                pl.BlockSpec((tile_rows, dim), lambda i: (i, 0)),
                pl.BlockSpec((1, dim), lambda i: (0, 0)),   # resident weight
            ],
            out_specs=pl.BlockSpec((tile_rows, dim), lambda i: (i, 0)),
        ),
        compiler_params=pltpu.CompilerParams(
            dimension_semantics=("parallel",),   # shards rows across v7x's 2 TCs
            vmem_limit_bytes=vmem_limit,
        ),
    )(x2d, w2d)

    return out2d.reshape(orig_shape)


def _rmsnorm_ref(x, weight, eps=DEFAULT_EPS):
    xf = x.astype(jnp.float32)
    inv = jax.lax.rsqrt(jnp.mean(xf * xf, axis=-1, keepdims=True) + eps)
    return (xf * inv).astype(x.dtype) * weight.astype(x.dtype)


if __name__ == "__main__":
    key = jax.random.PRNGKey(0)
    batch, seq, hidden = 2, 8, 32

    x = jax.random.normal(key, (batch, seq, hidden), dtype=jnp.float32)
    # Module __init__: self.weight = torch.nn.Parameter(torch.ones(dim))
    weight = jnp.ones((hidden,), dtype=jnp.float32)

    out = jax.block_until_ready(rmsnorm(x, weight))
    ref = _rmsnorm_ref(x, weight)
    assert out.shape == x.shape and out.dtype == x.dtype
    assert jnp.allclose(out, ref, atol=1e-5, rtol=1e-5)

    # Non-trivial weight + ragged rows (rows not a multiple of the tile):
    # exercises Pallas' masked handling of the last row-block (no pad/slice
    # copies in the wrapper).
    w2 = jax.random.normal(jax.random.PRNGKey(2), (hidden,), dtype=jnp.float32)
    x2 = jax.random.normal(jax.random.PRNGKey(1), (3, 5, hidden),
                           dtype=jnp.float32)
    out2 = jax.block_until_ready(rmsnorm(x2, w2))
    ref2 = _rmsnorm_ref(x2, w2)
    assert out2.shape == x2.shape
    assert jnp.allclose(out2, ref2, atol=1e-5, rtol=1e-5)

    print("KERNEL_OK")
</pallas_src>

<mosaic_0001>
module attributes {stable_mosaic.version = 11 : i64} {
  func.func @_lambda_(%arg0: i32, %arg1: memref<16x32xf32, #tpu.memory_space<vmem>>, %arg2: memref<1x32xf32, #tpu.memory_space<vmem>>, %arg3: memref<16x32xf32, #tpu.memory_space<vmem>>) attributes {dimension_semantics = [#tpu.dimension_semantics<parallel>], iteration_bounds = array<i64: 1>, scalar_prefetch = 0 : i64, scratch_operands = 0 : i64, tpu.core_type = #tpu.core_type<tc>, window_params = [{transform_indices = @transform_0, window_bounds = array<i64: 16, 32>}, {pipeline_mode = #tpu.pipeline_mode<synchronous>, transform_indices = @transform_1, window_bounds = array<i64: 1, 32>}, {transform_indices = @transform_2, window_bounds = array<i64: 16, 32>}]} {
    %c0 = arith.constant 0 : index
    %c0_0 = arith.constant 0 : index
    %0 = vector.load %arg1[%c0, %c0_0] : memref<16x32xf32, #tpu.memory_space<vmem>>, vector<16x32xf32>
    %1 = arith.mulf %0, %0 : vector<16x32xf32>
    %cst = arith.constant dense<0.000000e+00> : vector<16xf32>
    %2 = vector.multi_reduction <add>, %1, %cst [1] : vector<16x32xf32> to vector<16xf32>
    %3 = vector.shape_cast %2 : vector<16xf32> to vector<16x1xf32>
    %cst_1 = arith.constant 3.125000e-02 : f32
    %4 = vector.broadcast %cst_1 : f32 to vector<16x1xf32>
    %5 = arith.mulf %3, %4 : vector<16x1xf32>
    %cst_2 = arith.constant 9.99999974E-6 : f32
    %6 = vector.broadcast %cst_2 : f32 to vector<16x1xf32>
    %7 = arith.addf %5, %6 : vector<16x1xf32>
    %8 = math.rsqrt %7 : vector<16x1xf32>
    %9 = vector.broadcast %8 : vector<16x1xf32> to vector<16x32xf32>
    %10 = arith.mulf %0, %9 : vector<16x32xf32>
    %c0_3 = arith.constant 0 : index
    %c0_4 = arith.constant 0 : index
    %11 = vector.load %arg2[%c0_3, %c0_4] : memref<1x32xf32, #tpu.memory_space<vmem>>, vector<1x32xf32>
    %12 = vector.broadcast %11 : vector<1x32xf32> to vector<16x32xf32>
    %13 = arith.mulf %10, %12 : vector<16x32xf32>
    %c0_5 = arith.constant 0 : index
    %c0_6 = arith.constant 0 : index
    %14 = vector.load %arg3[%c0_5, %c0_6] : memref<16x32xf32, #tpu.memory_space<vmem>>, vector<16x32xf32>
    tpu.vector_store %arg3[%c0_5, %c0_6], %13 {strides = array<i32>} : memref<16x32xf32, #tpu.memory_space<vmem>>, vector<16x32xf32>,
    return
  }
  func.func @transform_0(%arg0: i32) -> (i32, i32) {
    %c0_i32 = arith.constant 0 : i32
    %c0_i32_0 = arith.constant 0 : i32
    return %arg0, %c0_i32 : i32, i32
  }
  func.func @transform_1(%arg0: i32) -> (i32, i32) {
    %c0_i32 = arith.constant 0 : i32
    %c0_i32_0 = arith.constant 0 : i32
    %c0_i32_1 = arith.constant 0 : i32
    return %c0_i32, %c0_i32_0 : i32, i32
  }
  func.func @transform_2(%arg0: i32) -> (i32, i32) {
    %c0_i32 = arith.constant 0 : i32
    %c0_i32_0 = arith.constant 0 : i32
    return %arg0, %c0_i32 : i32, i32
  }
}

</mosaic_0001>

<bundles_post_ra>
// kernel: tpu_custom_call.1
= control target key start
LH: loop header
LB: loop body
LE: loop exit
PB: predicated region body
PF: predicated region fallthrough
CT: control target
= control target key end

     0   :  { %7 = vsyncpa [#allocation3], 0  ;;  %s164_s0 = inlined_call_operand.hbm [shape: f32[16,32], index: 0, kind: input, shape index: {}]   ;;  %s165_s1 = inlined_call_operand.vmem [shape: f32[1,32], index: 1, kind: input, shape index: {}]   ;;  %s166_s2 = inlined_call_operand.hbm [shape: f32[16,32], index: 2, kind: output, shape index: {}]  }
   0x1   :  { %8 = vsyncpa [#allocation4], 0  ;;  %s126_s9 = smov [#allocation2]  }
   0x2   :  { %s14_s10 = sshll.u32 %s126_s9, 4  ;;  %s15_s10 = int_to_ptr.vmem [resolvable:$true] %s14_s10 }
   0x3   :  { %s90_s11 = scalar_lea.vmem %s15_s10, 256  ;;  %p95_p1 = scmp.lt.s32.totalorder %s15_s10, %s15_s10 }
   0x4   :  { %p91_p0 = scmp.ne.s32.totalorder %s15_s10, %s90_s11  ;;  %p96_p2 = scmp.lt.s32.totalorder %s90_s11, %s90_s11 }
   0x6   :  { %p97_p3 = por %p96_p2, %p95_p1 }
   0x8   :  { %p98_p4 = pnand %p97_p3, %p91_p0 }
   0xa   :  { %101 = shalt.err (!%p98_p4)
}
   0xb   :  { %s127_s12 = smov 128   ;;  %s128_s13 = smov 8  }
   0xc   :  { %20 = dma.hbm_to_vmem [thread:$0]  %s164_s0, 256, %s15_s10, [#allocation3], %s127_s12, %s127_s12, %s128_s13  }
   0xd   :  { %122 = dma.done.wait [#allocation3], 256  }
   0xe   :  { %123 = vsyncadd [#allocation3], 4294967040  ;;  %v26_v0 = vld [vmem:[#allocation2] sm:$0xff]  ;;  %vm30_vm0 = vcmask 261120   ;;  %v27_v1 = vld [vmem:[#allocation2 + $0x8] sm:$0xff]  ;;  %s129_s17 = smov [#allocation5]  }
   0xf   :  { %v28_v2 = vmul.f32 %v26_v0, %v26_v0  ;;  %v29_v3 = vmul.f32 %v27_v1, %v27_v1  ;;  %v73_v13 = vld [vmem:[%s165_s1] ss:$0 sm:$0xff]  ;;  %s61_s18 = sshll.u32 %s129_s17, 4  ;;  %s62_s18 = int_to_ptr.vmem [resolvable:$true] %s61_s18 }
  0x10   :  { %s102_s19 = scalar_lea.vmem %s62_s18, 256  ;;  %p107_p6 = scmp.lt.s32.totalorder %s62_s18, %s62_s18 }
  0x11   :  { %v31_v4 = vsel %vm30_vm0, %v28_v2, 0.0  ;;  %v34_v5 = vsel %vm30_vm0, %v29_v3, 0.0  ;;  %p103_p5 = scmp.ne.s32.totalorder %s62_s18, %s102_s19  ;;  %p108_p7 = scmp.lt.s32.totalorder %s102_s19, %s102_s19 }
  0x12   :  { %32 = vadd.xlane.f32.xlu0 %v31_v4 }
  0x13   :  { %p109_p8 = por %p108_p7, %p107_p6 }
  0x15   :  { %p110_p9 = pnand %p109_p8, %p103_p5 }
  0x16   :  { %35 = vadd.xlane.f32.xlu0 %v34_v5 }
  0x9b   :  { %v33_v6 = vpop.xlane.xlu0 %32 }
  0x9c   :  { %v37_v7 = vmul.f32 0.03125, %v33_v6 }
  0x9e   :  { %v39_v8 = vadd.f32 1e-05, %v37_v7 }
  0x9f   :  { %v36_v9 = vpop.xlane.xlu0 %35 }
  0xa0   :  { %78 = vrsqrt.f32 %v39_v8  ;;  %v38_v10 = vmul.f32 0.03125, %v36_v9 }
  0xa2   :  { %v40_v11 = vadd.f32 1e-05, %v38_v10 }
  0xa4   :  { %80 = vrsqrt.f32 %v40_v11 }
  0xad   :  { %v79_v12 = vpop.eup %78 }
  0xae   :  { %v43_v14 = vmul.f32 %v79_v12, %v26_v0 }
  0xb0   :  { %v52_v15 = vmul.f32 %v73_v13, %v43_v14 }
  0xb1   :  { %v81_v16 = vpop.eup %80 }
  0xb2   :  { %v44_v17 = vmul.f32 %v81_v16, %v27_v1  ;;  %54 = vst.msk [vmem:[#allocation5] sm:$0xff] %vm30_vm0, %v52_v15 }
  0xb4   :  { %v53_v18 = vmul.f32 %v73_v13, %v44_v17 }
  0xb6   :  { %55 = vst.msk [vmem:[#allocation5 + $0x8] sm:$0xff] %vm30_vm0, %v53_v18 }
  0xb7   :  { %113 = shalt.err (!%p110_p9)
}
  0xb8   :  { %67 = dma.vmem_to_hbm [thread:$0]  %s62_s18, 256, %s166_s2, [#allocation4], %s127_s12, %s127_s12, %s128_s13  }
  0xb9   :  { %124 = dma.done.wait [#allocation4], 256  }
  0xba   :  { %125 = vsyncadd [#allocation4], 4294967040 }
  0xbb   :  { %71 = vsyncpa [#allocation3], 1 }
  0xbc   :  { %72 = vsyncpa [#allocation4], 1 }

</bundles_post_ra>
